<compile_context>
chip_gen: v7x
topology: tpu7x:2x2x1
jax: 0.10.0
libtpu: 0.0.40
codegen_flags: <defaults>
</compile_context>

<pallas_src>
import functools

import jax
import jax.numpy as jnp
from jax import lax
from jax.experimental import pallas as pl
from jax.experimental.pallas import tpu as pltpu

LANE = 128


# --------------------------------------------------------------------------- #
# Helpers
# --------------------------------------------------------------------------- #
def _vmem_budget_bytes():
    """Usable VMEM per pallas_call: physical capacity minus ~1/8 headroom.

    v5e/v6e (128 MiB) -> ~112 MiB, v7x (64 MiB) -> ~56 MiB.
    """
    try:
        cap = int(pltpu.get_tpu_info().vmem_capacity_bytes)
    except Exception:
        cap = 64 * 1024 * 1024          # conservative default (v7x physical VMEM)
    return cap - max(cap // 8, 8 * 1024 * 1024)


def _pick_chunk(span, c, lane_chunk):
    """Largest 128-multiple chunk <= min(lane_chunk, span) with a modest
    (~16 live f32 vregs) per-chunk footprint, so spills never contend with the
    single vector-store slot (v5e)."""
    if span < LANE:
        return 0
    cap_elems = 16 * 1024
    mult = min(lane_chunk // LANE, span // LANE, max(1, cap_elems // (c * LANE)))
    return max(1, mult) * LANE


def _excite(pooled, w1t_ref, b1_ref, w2_ref, b2_ref):
    """Tiny squeeze-excitation MLP, all VPU/XLU, gate stays in (C, 1) layout."""
    w1t = w1t_ref[...].astype(jnp.float32)                       # (C, Ch)
    h = jnp.sum(w1t * pooled, axis=0, keepdims=True)             # (1, Ch)
    h = jnp.maximum(h + b1_ref[...].astype(jnp.float32), 0.0)    # relu
    w2 = w2_ref[...].astype(jnp.float32)                         # (C, Ch)
    z = jnp.sum(w2 * h, axis=1, keepdims=True)                   # (C, 1)
    z = z + b2_ref[...].astype(jnp.float32)
    # sigmoid: exp(-z) -> inf for very negative z, 1/(1+inf) = 0 (safe in f32)
    return 1.0 / (1.0 + jnp.exp(-z))                             # (C, 1) f32


# --------------------------------------------------------------------------- #
# Default path: one (C, HW) slab per batch element
# --------------------------------------------------------------------------- #
def _se_slab_kernel(x_ref, w1t_ref, b1_ref, w2_ref, b2_ref, o_ref,
                    *, hw, chunk, n_full, tail):
    """x_ref / o_ref: (C, HW) in native dtype (one batch element per grid step)."""
    c_dim = x_ref.shape[0]
    unroll = n_full if 0 < n_full <= 4 else 2

    # ---- Squeeze: global average pool over the spatial (lane) axis ----------
    acc = jnp.zeros((c_dim, 1), jnp.float32)
    if n_full > 0:
        def pool_body(i, a):
            start = pl.multiple_of(i * chunk, LANE)
            blk = x_ref[:, pl.ds(start, chunk)].astype(jnp.float32)
            return a + jnp.sum(blk, axis=-1, keepdims=True)

        acc = lax.fori_loop(0, n_full, pool_body, acc, unroll=unroll)
    if tail > 0:
        # Static ragged tail (no pad/slice HBM passes outside the kernel).
        tblk = x_ref[:, n_full * chunk:hw].astype(jnp.float32)
        acc = acc + jnp.sum(tblk, axis=-1, keepdims=True)
    pooled = acc * jnp.float32(1.0 / hw)                          # (C, 1)

    # ---- Excitation MLP ------------------------------------------------------
    s = _excite(pooled, w1t_ref, b1_ref, w2_ref, b2_ref)
    # Multiply in the activation dtype (bf16 stays bf16 on v6e/v7x).
    s_out = s.astype(o_ref.dtype)

    # ---- Scale: lane-dense chunks streamed straight to o_ref -----------------
    if n_full > 0:
        def scale_body(i, carry):
            start = pl.multiple_of(i * chunk, LANE)
            o_ref[:, pl.ds(start, chunk)] = x_ref[:, pl.ds(start, chunk)] * s_out
            return carry

        lax.fori_loop(0, n_full, scale_body, 0, unroll=unroll)
    if tail > 0:
        o_ref[:, n_full * chunk:hw] = x_ref[:, n_full * chunk:hw] * s_out


def _slab_call(x, w1t, b1r, w2m, b2c, *, hw, lane_chunk, vmem_limit):
    B, C, _ = x.shape
    Ch = w1t.shape[1]
    itemsize = jnp.dtype(x.dtype).itemsize

    chunk = _pick_chunk(hw, C, lane_chunk)
    n_full = hw // chunk if chunk else 0
    tail = hw - n_full * chunk

    kernel = functools.partial(_se_slab_kernel, hw=hw, chunk=chunk,
                               n_full=n_full, tail=tail)
    param_bytes = (2 * C * Ch + Ch + C) * 4
    cost = pl.CostEstimate(
        flops=2 * B * C * hw + 4 * B * C * Ch,
        transcendentals=B * C,
        bytes_accessed=2 * B * C * hw * itemsize + param_bytes)

    return pl.pallas_call(
        kernel,
        out_shape=jax.ShapeDtypeStruct((B, C, hw), x.dtype),
        grid=(B,),
        in_specs=[
            pl.BlockSpec((None, C, hw), lambda b: (b, 0, 0)),   # one slab per step
            pl.BlockSpec((C, Ch), lambda b: (0, 0)),            # fc1 weight^T
            pl.BlockSpec((1, Ch), lambda b: (0, 0)),            # fc1 bias (row)
            pl.BlockSpec((C, Ch), lambda b: (0, 0)),            # fc2 weight
            pl.BlockSpec((C, 1), lambda b: (0, 0)),             # fc2 bias (col)
        ],
        out_specs=pl.BlockSpec((None, C, hw), lambda b: (b, 0, 0)),
        compiler_params=pltpu.CompilerParams(
            dimension_semantics=("parallel",),
            vmem_limit_bytes=int(vmem_limit)),
        cost_estimate=cost,
    )(x, w1t, b1r, w2m, b2c)


# --------------------------------------------------------------------------- #
# Fallback path: two-phase tiled pipeline over (B, HW-tiles)
# --------------------------------------------------------------------------- #
def _tiled_pool_kernel(x_ref, w1t_ref, b1_ref, w2_ref, b2_ref, s_ref, acc_ref,
                       *, hw, tile_hw, chunk, n_chunks):
    t = pl.program_id(1)

    @pl.when(t == 0)
    def _():
        acc_ref[...] = jnp.zeros_like(acc_ref)

    c_dim = x_ref.shape[0]
    valid = hw - t * tile_hw                 # in-bounds lanes of this tile
    unroll = n_chunks if n_chunks <= 4 else 2

    def body(i, a):
        start = pl.multiple_of(i * chunk, LANE)
        col = start + lax.broadcasted_iota(jnp.int32, (c_dim, chunk), 1)
        blk = x_ref[:, pl.ds(start, chunk)].astype(jnp.float32)
        blk = jnp.where(col < valid, blk, 0.0)   # mask overhanging (ragged) lanes
        return a + jnp.sum(blk, axis=-1, keepdims=True)

    acc_ref[...] += lax.fori_loop(0, n_chunks, body,
                                  jnp.zeros((c_dim, 1), jnp.float32),
                                  unroll=unroll)

    @pl.when(t == pl.num_programs(1) - 1)
    def _():
        pooled = acc_ref[...] * jnp.float32(1.0 / hw)
        s_ref[...] = _excite(pooled, w1t_ref, b1_ref, w2_ref, b2_ref)


def _tiled_scale_kernel(x_ref, s_ref, o_ref, *, chunk, n_chunks):
    s_out = s_ref[...].astype(o_ref.dtype)   # (C, 1), hoisted out of the loop
    unroll = n_chunks if n_chunks <= 4 else 2

    def body(i, carry):
        start = pl.multiple_of(i * chunk, LANE)
        o_ref[:, pl.ds(start, chunk)] = x_ref[:, pl.ds(start, chunk)] * s_out
        return carry

    lax.fori_loop(0, n_chunks, body, 0, unroll=unroll)


def _tiled_call(x, w1t, b1r, w2m, b2c, *, hw, lane_chunk, tile_hw, budget):
    B, C, _ = x.shape
    Ch = w1t.shape[1]
    itemsize = jnp.dtype(x.dtype).itemsize

    if tile_hw is None:
        # ~1 MiB tiles: good DMA granularity, double-buffers on any generation.
        target = 1 << 20
        mult = max(1, min(target // (C * itemsize * LANE), pl.cdiv(hw, LANE)))
        tile_hw = int(mult) * LANE
    chunk = _pick_chunk(tile_hw, C, lane_chunk)
    n_chunks = max(1, tile_hw // chunk)
    tile_hw = n_chunks * chunk               # make chunk divide the tile exactly
    n_tiles = pl.cdiv(hw, tile_hw)

    param_bytes = (2 * C * Ch + Ch + C) * 4
    tile_bytes = C * tile_hw * itemsize
    vmem_pool = int(min(budget, max(32 << 20, 2 * tile_bytes + param_bytes + (2 << 20))))
    vmem_scale = int(min(budget, max(32 << 20, 4 * tile_bytes + (2 << 20))))

    # Phase 0: pool over HW tiles, excitation MLP on the last tile -> gate (B, C, 1)
    pool_kernel = functools.partial(_tiled_pool_kernel, hw=hw, tile_hw=tile_hw,
                                    chunk=chunk, n_chunks=n_chunks)
    gate = pl.pallas_call(
        pool_kernel,
        out_shape=jax.ShapeDtypeStruct((B, C, 1), jnp.float32),
        grid=(B, n_tiles),
        in_specs=[
            pl.BlockSpec((None, C, tile_hw), lambda b, t: (b, 0, t)),
            pl.BlockSpec((C, Ch), lambda b, t: (0, 0)),
            pl.BlockSpec((1, Ch), lambda b, t: (0, 0)),
            pl.BlockSpec((C, Ch), lambda b, t: (0, 0)),
            pl.BlockSpec((C, 1), lambda b, t: (0, 0)),
        ],
        out_specs=pl.BlockSpec((None, C, 1), lambda b, t: (b, 0, 0)),
        scratch_shapes=[pltpu.VMEM((C, 1), jnp.float32)],
        compiler_params=pltpu.CompilerParams(
            dimension_semantics=("parallel", "arbitrary"),
            vmem_limit_bytes=vmem_pool),
        cost_estimate=pl.CostEstimate(
            flops=3 * B * C * hw + 4 * B * C * Ch,
            transcendentals=B * C,
            bytes_accessed=B * C * hw * itemsize + param_bytes + B * C * 4),
    )(x, w1t, b1r, w2m, b2c)

    # Phase 1: stream x again and apply the per-channel gate.
    scale_kernel = functools.partial(_tiled_scale_kernel, chunk=chunk,
                                     n_chunks=n_chunks)
    return pl.pallas_call(
        scale_kernel,
        out_shape=jax.ShapeDtypeStruct((B, C, hw), x.dtype),
        grid=(B, n_tiles),
        in_specs=[
            pl.BlockSpec((None, C, tile_hw), lambda b, t: (b, 0, t)),
            pl.BlockSpec((None, C, 1), lambda b, t: (b, 0, 0)),
        ],
        out_specs=pl.BlockSpec((None, C, tile_hw), lambda b, t: (b, 0, t)),
        compiler_params=pltpu.CompilerParams(
            dimension_semantics=("parallel", "parallel"),
            vmem_limit_bytes=vmem_scale),
        cost_estimate=pl.CostEstimate(
            flops=B * C * hw,
            transcendentals=0,
            bytes_accessed=2 * B * C * hw * itemsize + B * C * 4),
    )(x, gate)


# --------------------------------------------------------------------------- #
# Public wrapper
# --------------------------------------------------------------------------- #
@functools.partial(jax.jit, static_argnames=("lane_chunk", "force_tiled", "tile_hw"))
def se_block(x_nchw, w1, b1, w2, b2, *, lane_chunk=512, force_tiled=False,
             tile_hw=None):
    """SEBlock forward.

    x_nchw: (B, C, H, W), dtype preserved (f32 or bf16)
    w1: (Ch, C), b1: (Ch,)  -- PyTorch nn.Linear(C  -> Ch) convention
    w2: (C, Ch), b2: (C,)   -- PyTorch nn.Linear(Ch -> C ) convention
    """
    B, C, H, W = x_nchw.shape
    Ch = w1.shape[0]
    hw = H * W
    itemsize = jnp.dtype(x_nchw.dtype).itemsize
    lane_chunk = max(LANE, (int(lane_chunk) // LANE) * LANE)

    # Contiguous (B, C, H*W) view -- free under jit; no pad, no post-slice.
    x = x_nchw.reshape(B, C, hw)

    # Tiny MLP params laid out so the gate math never needs a transpose.
    w1t = jnp.transpose(w1).astype(jnp.float32)     # (C, Ch)
    b1r = b1.reshape(1, Ch).astype(jnp.float32)     # (1, Ch)
    w2m = w2.astype(jnp.float32)                    # (C, Ch)
    b2c = b2.reshape(C, 1).astype(jnp.float32)      # (C, 1)

    budget = _vmem_budget_bytes()
    param_bytes = (2 * C * Ch + Ch + C) * 4
    # Slab path requirement: 2x in + 2x out blocks (double-buffered) + params + margin.
    need_slab = 4 * C * hw * itemsize + param_bytes + (2 << 20)

    if force_tiled or need_slab > budget:
        # Slab would not fit double-buffered (e.g. large C*HW f32 on v7x's
        # 64 MiB VMEM): two-phase tiled pipeline.  One extra read of x, but deep
        # pipelining and many grid steps for both TensorCores.
        out = _tiled_call(x, w1t, b1r, w2m, b2c, hw=hw, lane_chunk=lane_chunk,
                          tile_hw=tile_hw, budget=budget)
    else:
        # NOTE: with very small B this gives few grid steps (one idle v7x core
        # for B=1); the tiled path above is the remedy if that ever dominates.
        out = _slab_call(x, w1t, b1r, w2m, b2c, hw=hw, lane_chunk=lane_chunk,
                         vmem_limit=min(budget, max(32 << 20, need_slab)))
    return out.reshape(B, C, H, W)


def se_block_ref(x, w1, b1, w2, b2):
    """Pure-JAX reference mirroring the PyTorch forward."""
    pooled = jnp.mean(x, axis=(2, 3))                       # (B, C)
    h = jnp.maximum(pooled @ w1.T + b1, 0.0)                # fc1 + relu
    s = jax.nn.sigmoid(h @ w2.T + b2)                       # fc2 + sigmoid
    return x * s[:, :, None, None]


if __name__ == "__main__":
    key = jax.random.PRNGKey(0)
    kx, k1, k2, k3, k4, k5, k6 = jax.random.split(key, 7)

    B, C, H, W = 2, 16, 16, 16
    reduction_ratio = 8
    Ch = C // reduction_ratio

    x = jax.random.normal(kx, (B, C, H, W), dtype=jnp.float32)
    # nn.Linear(in_channels, in_channels // r): weight (Ch, C), bias (Ch,)
    w1 = 0.1 * jax.random.normal(k1, (Ch, C), dtype=jnp.float32)
    b1 = 0.1 * jax.random.normal(k2, (Ch,), dtype=jnp.float32)
    # nn.Linear(in_channels // r, in_channels): weight (C, Ch), bias (C,)
    w2 = 0.1 * jax.random.normal(k3, (C, Ch), dtype=jnp.float32)
    b2 = 0.1 * jax.random.normal(k4, (C,), dtype=jnp.float32)

    # 1) Default single-pass slab path (HW a multiple of 128).
    y = se_block(x, w1, b1, w2, b2)
    jax.block_until_ready(y)
    y_ref = se_block_ref(x, w1, b1, w2, b2)
    assert jnp.allclose(y, y_ref, atol=1e-5, rtol=1e-5), "slab path mismatch"

    # 2) Ragged spatial sizes -- handled by the static in-kernel tail, no padding.
    x2 = jax.random.normal(k5, (B, C, 15, 15), dtype=jnp.float32)   # HW = 225
    y2 = se_block(x2, w1, b1, w2, b2)
    jax.block_until_ready(y2)
    assert jnp.allclose(y2, se_block_ref(x2, w1, b1, w2, b2),
                        atol=1e-5, rtol=1e-5), "ragged slab path mismatch"

    x3 = jax.random.normal(k6, (B, C, 7, 9), dtype=jnp.float32)     # HW = 63 < 128
    y3 = se_block(x3, w1, b1, w2, b2)
    jax.block_until_ready(y3)
    assert jnp.allclose(y3, se_block_ref(x3, w1, b1, w2, b2),
                        atol=1e-5, rtol=1e-5), "small spatial path mismatch"

    # 3) Two-phase tiled fallback (selected automatically when the per-batch
    #    slab would not fit double-buffered in VMEM, e.g. large C*HW on v7x).
    y4 = se_block(x, w1, b1, w2, b2, force_tiled=True, tile_hw=128)
    jax.block_until_ready(y4)
    assert jnp.allclose(y4, y_ref, atol=1e-5, rtol=1e-5), "tiled fallback mismatch"

    print("KERNEL_OK")
</pallas_src>

<mosaic_0001>
module attributes {stable_mosaic.version = 11 : i64} {
  func.func @_se_slab_kernel(%arg0: i32, %arg1: memref<1x16x256xf32, #tpu.memory_space<vmem>>, %arg2: memref<16x2xf32, #tpu.memory_space<vmem>>, %arg3: memref<1x2xf32, #tpu.memory_space<vmem>>, %arg4: memref<16x2xf32, #tpu.memory_space<vmem>>, %arg5: memref<16x1xf32, #tpu.memory_space<vmem>>, %arg6: memref<1x16x256xf32, #tpu.memory_space<vmem>>) attributes {dimension_semantics = [#tpu.dimension_semantics<parallel>], iteration_bounds = array<i64: 2>, scalar_prefetch = 0 : i64, scratch_operands = 0 : i64, tpu.core_type = #tpu.core_type<tc>, window_params = [{transform_indices = @transform_0, window_bounds = array<i64: 1, 16, 256>}, {pipeline_mode = #tpu.pipeline_mode<synchronous>, transform_indices = @transform_1, window_bounds = array<i64: 16, 2>}, {pipeline_mode = #tpu.pipeline_mode<synchronous>, transform_indices = @transform_2, window_bounds = array<i64: 1, 2>}, {pipeline_mode = #tpu.pipeline_mode<synchronous>, transform_indices = @transform_3, window_bounds = array<i64: 16, 2>}, {pipeline_mode = #tpu.pipeline_mode<synchronous>, transform_indices = @transform_4, window_bounds = array<i64: 16, 1>}, {transform_indices = @transform_5, window_bounds = array<i64: 1, 16, 256>}]} {
    %cst = arith.constant 0.000000e+00 : f32
    %0 = vector.broadcast %cst : f32 to vector<16x1xf32>
    %c0_i32 = arith.constant 0 : i32
    %c256_i32 = arith.constant 256 : i32
    %1 = arith.muli %c0_i32, %c256_i32 : i32
    %2 = tpu.assume_multiple %1, 128 : i32
    %c0 = arith.constant 0 : index
    %c0_0 = arith.constant 0 : index
    %3 = arith.index_cast %2 : i32 to index
    %4 = vector.load %arg1[%c0, %c0_0, %3] : memref<1x16x256xf32, #tpu.memory_space<vmem>>, vector<1x16x256xf32>
    %5 = vector.shape_cast %4 : vector<1x16x256xf32> to vector<16x256xf32>
    %cst_1 = arith.constant dense<0.000000e+00> : vector<16xf32>
    %6 = vector.multi_reduction <add>, %5, %cst_1 [1] : vector<16x256xf32> to vector<16xf32>
    %7 = vector.shape_cast %6 : vector<16xf32> to vector<16x1xf32>
    %8 = arith.addf %0, %7 : vector<16x1xf32>
    %c1_i32 = arith.constant 1 : i32
    %cst_2 = arith.constant 3.906250e-03 : f32
    %9 = vector.broadcast %cst_2 : f32 to vector<16x1xf32>
    %10 = arith.mulf %8, %9 : vector<16x1xf32>
    %c0_3 = arith.constant 0 : index
    %c0_4 = arith.constant 0 : index
    %11 = vector.load %arg2[%c0_3, %c0_4] : memref<16x2xf32, #tpu.memory_space<vmem>>, vector<16x2xf32>
    %12 = vector.broadcast %10 : vector<16x1xf32> to vector<16x2xf32>
    %13 = arith.mulf %11, %12 : vector<16x2xf32>
    %cst_5 = arith.constant dense<0.000000e+00> : vector<2xf32>
    %14 = vector.multi_reduction <add>, %13, %cst_5 [0] : vector<16x2xf32> to vector<2xf32>
    %15 = vector.shape_cast %14 : vector<2xf32> to vector<1x2xf32>
    %c0_6 = arith.constant 0 : index
    %c0_7 = arith.constant 0 : index
    %16 = vector.load %arg3[%c0_6, %c0_7] : memref<1x2xf32, #tpu.memory_space<vmem>>, vector<1x2xf32>
    %17 = arith.addf %15, %16 : vector<1x2xf32>
    %cst_8 = arith.constant 0.000000e+00 : f32
    %18 = vector.broadcast %cst_8 : f32 to vector<1x2xf32>
    %19 = arith.maximumf %17, %18 : vector<1x2xf32>
    %c0_9 = arith.constant 0 : index
    %c0_10 = arith.constant 0 : index
    %20 = vector.load %arg4[%c0_9, %c0_10] : memref<16x2xf32, #tpu.memory_space<vmem>>, vector<16x2xf32>
    %21 = vector.broadcast %19 : vector<1x2xf32> to vector<16x2xf32>
    %22 = arith.mulf %20, %21 : vector<16x2xf32>
    %cst_11 = arith.constant dense<0.000000e+00> : vector<16xf32>
    %23 = vector.multi_reduction <add>, %22, %cst_11 [1] : vector<16x2xf32> to vector<16xf32>
    %24 = vector.shape_cast %23 : vector<16xf32> to vector<16x1xf32>
    %c0_12 = arith.constant 0 : index
    %c0_13 = arith.constant 0 : index
    %25 = vector.load %arg5[%c0_12, %c0_13] : memref<16x1xf32, #tpu.memory_space<vmem>>, vector<16x1xf32>
    %26 = arith.addf %24, %25 : vector<16x1xf32>
    %cst_14 = arith.constant 0.000000e+00 : f32
    %27 = vector.broadcast %cst_14 : f32 to vector<16x1xf32>
    %28 = arith.subf %27, %26 : vector<16x1xf32>
    %29 = math.exp %28 : vector<16x1xf32>
    %cst_15 = arith.constant 1.000000e+00 : f32
    %30 = vector.broadcast %cst_15 : f32 to vector<16x1xf32>
    %31 = arith.addf %30, %29 : vector<16x1xf32>
    %cst_16 = arith.constant 1.000000e+00 : f32
    %32 = vector.broadcast %cst_16 : f32 to vector<16x1xf32>
    %33 = arith.divf %32, %31 : vector<16x1xf32>
    %c0_i32_17 = arith.constant 0 : i32
    %c256_i32_18 = arith.constant 256 : i32
    %34 = arith.muli %c0_i32_17, %c256_i32_18 : i32
    %35 = tpu.assume_multiple %34, 128 : i32
    %c0_19 = arith.constant 0 : index
    %c0_20 = arith.constant 0 : index
    %36 = arith.index_cast %35 : i32 to index
    %37 = vector.load %arg1[%c0_19, %c0_20, %36] : memref<1x16x256xf32, #tpu.memory_space<vmem>>, vector<1x16x256xf32>
    %38 = vector.shape_cast %37 : vector<1x16x256xf32> to vector<16x256xf32>
    %39 = vector.broadcast %33 : vector<16x1xf32> to vector<16x256xf32>
    %40 = arith.mulf %38, %39 : vector<16x256xf32>
    %c0_21 = arith.constant 0 : index
    %c0_22 = arith.constant 0 : index
    %41 = arith.index_cast %35 : i32 to index
    %42 = vector.load %arg6[%c0_21, %c0_22, %41] : memref<1x16x256xf32, #tpu.memory_space<vmem>>, vector<1x16x256xf32>
    %43 = vector.shape_cast %42 : vector<1x16x256xf32> to vector<16x256xf32>
    %44 = vector.shape_cast %40 : vector<16x256xf32> to vector<1x16x256xf32>
    tpu.vector_store %arg6[%c0_21, %c0_22, %41], %44 {strides = array<i32>} : memref<1x16x256xf32, #tpu.memory_space<vmem>>, vector<1x16x256xf32>,
    %c1_i32_23 = arith.constant 1 : i32
    return
  }
  func.func @transform_0(%arg0: i32) -> (i32, i32, i32) {
    %c0_i32 = arith.constant 0 : i32
    %c0_i32_0 = arith.constant 0 : i32
    %c0_i32_1 = arith.constant 0 : i32
    return %arg0, %c0_i32, %c0_i32_0 : i32, i32, i32
  }
  func.func @transform_1(%arg0: i32) -> (i32, i32) {
    %c0_i32 = arith.constant 0 : i32
    %c0_i32_0 = arith.constant 0 : i32
    %c0_i32_1 = arith.constant 0 : i32
    return %c0_i32, %c0_i32_0 : i32, i32
  }
  func.func @transform_2(%arg0: i32) -> (i32, i32) {
    %c0_i32 = arith.constant 0 : i32
    %c0_i32_0 = arith.constant 0 : i32
    %c0_i32_1 = arith.constant 0 : i32
    return %c0_i32, %c0_i32_0 : i32, i32
  }
  func.func @transform_3(%arg0: i32) -> (i32, i32) {
    %c0_i32 = arith.constant 0 : i32
    %c0_i32_0 = arith.constant 0 : i32
    %c0_i32_1 = arith.constant 0 : i32
    return %c0_i32, %c0_i32_0 : i32, i32
  }
  func.func @transform_4(%arg0: i32) -> (i32, i32) {
    %c0_i32 = arith.constant 0 : i32
    %c0_i32_0 = arith.constant 0 : i32
    %c0_i32_1 = arith.constant 0 : i32
    return %c0_i32, %c0_i32_0 : i32, i32
  }
  func.func @transform_5(%arg0: i32) -> (i32, i32, i32) {
    %c0_i32 = arith.constant 0 : i32
    %c0_i32_0 = arith.constant 0 : i32
    %c0_i32_1 = arith.constant 0 : i32
    return %arg0, %c0_i32, %c0_i32_0 : i32, i32, i32
  }
}

</mosaic_0001>

<bundles_post_ra>
// kernel: se_block.1
= control target key start
LH: loop header
LB: loop body
LE: loop exit
PB: predicated region body
PF: predicated region fallthrough
CT: control target
= control target key end

     0   :  { %s430_s18 = smov 0   ;;  %s495_s0 = inlined_call_operand.vmem [shape: f32[2,16,256], index: 0, kind: input, shape index: {}]   ;;  %s496_s1 = inlined_call_operand.vmem [shape: f32[16,2], index: 1, kind: input, shape index: {}]   ;;  %s497_s2 = inlined_call_operand.vmem [shape: f32[1,2], index: 2, kind: input, shape index: {}]   ;;  %s498_s3 = inlined_call_operand.vmem [shape: f32[16,2], index: 3, kind: input, shape index: {}]   ;;  %s499_s4 = inlined_call_operand.vmem [shape: f32[16,1], index: 4, kind: input, shape index: {}]   ;;  %s500_s5 = inlined_call_operand.vmem [shape: f32[2,16,256], index: 5, kind: output, shape index: {}]  }
   0x1 LB: > { %s359_s19 = sadd.s32 4294967295, %s397_s18   ;;  %p363_p0 = scmp.ge.s32.totalorder %s397_s18, 1  ;;  %s397_s18 = sphi %s430_s18, %s15_s18  }
   0x2   : > { %p187_p1 = scmp.lt.s32.totalorder %s397_s18, 3 }
   0x4   : > { %p188_p2 = pnand %p363_p0, %p187_p1 }
   0x5   : > { %p215_p3 = scmp.lt.s32.totalorder (!%p188_p2), %s359_s19, 1  ;;  %v239_v8 = vld [vmem:[%s496_s1] sm:$0xff] (!%p188_p2)  ;;  %v240_v9 = vld [vmem:[%s496_s1 + $0x8] sm:$0xff] (!%p188_p2)  ;;  %vm243_vm0 = vcmask (!%p188_p2), 15360   ;;  %v258_v20 = vlaneseq (!%p188_p2)  ;;  %v399_v36 = vmov (!%p188_p2), 0  }
   0x6   : > { %191 = sbr.rel (%p188_p2) target bundleno = 500 (0x1f4), region = 40  ;;  %v253_v24 = vld [vmem:[%s497_s2] sm:$0x1] (!%p188_p2)  ;;  %v257_v31 = vld [vmem:[%s498_s3 + $0x8] sm:$0xff] (!%p188_p2)  ;;  %381 = vset.pattern.permute.xlu0 (!%p188_p2), %v399_v36  ;;  %382 = vset.pattern.permute.xlu1 (!%p188_p2), %v399_v36 }
   0x7   : > { %v259_v23 = vshrl.u32 (!%p188_p2), %v258_v20, 7  ;;  %v256_v29 = vld [vmem:[%s498_s3] sm:$0xff] (!%p188_p2)  ;;  %v271_v40 = vld [vmem:[%s499_s4 + $0x8] sm:$0xff] (!%p188_p2) }
   0x8   : > { %v270_v37 = vld [vmem:[%s499_s4] sm:$0xff] (!%p188_p2) }
   0x9   : > { %v260_v27 = vsub.s32 (!%p188_p2), 0, %v259_v23 }
   0xd   : > { %s502_s19 = smov (!%p215_p3, %s359_s19), 1 }
   0xe   : > { %s370_s20 = sshll.u32 %s502_s19, 5 }
   0xf   : > { %s219_s23 = scalar_lea.vmem %s495_s0, %s370_s20  ;;  %s224_s15 = scalar_lea.vmem %s500_s5, %s370_s20 }
  0x10   : > { %v446_v0 = vld [vmem:[%s219_s23] sm:$0xff]  ;;  %v448_v1 = vld [vmem:[%s219_s23 + $0x8] sm:$0xff]  ;;  %v450_v2 = vld [vmem:[%s219_s23 + $0x10] sm:$0xff] }
  0x11   : > { %v229_v3 = vadd.f32 %v448_v1, %v446_v0  ;;  %v454_v4 = vld [vmem:[%s219_s23 + $0x18] sm:$0xff] }
  0x12   : > { %v232_v5 = vadd.f32 %v454_v4, %v450_v2 }
  0x13   : > { %230 = vadd.xlane.f32.xlu0 %v229_v3 }
  0x17   : > { %233 = vadd.xlane.f32.xlu0 %v232_v5 }
  0xa0   : > { %v231_v6 = vpop.xlane.xlu0 %230 }
  0xa1   : > { %v237_v7 = vmul.f32 0.00390625, %v231_v6 }
  0xa3   : > { %v241_v11 = vmul.f32 %v239_v8, %v237_v7 }
  0xa4   : > { %v234_v10 = vpop.xlane.xlu0 %233 }
  0xa5   : > { %v238_v12 = vmul.f32 0.00390625, %v234_v10  ;;  %v244_v14 = vsel %vm243_vm0, %v241_v11, 0.0 }
  0xa7   : > { %v242_v13 = vmul.f32 %v240_v9, %v238_v12 }
  0xa9   : > { %v245_v15 = vsel %vm243_vm0, %v242_v13, 0.0 }
  0xaa   : > { %v246_v16 = vadd.f32 %v245_v15, %v244_v14 }
  0xac   : > { %v247_v17 = vrot.slane %v246_v16, 4 }
  0xae   : > { %v248_v18 = vadd.f32 %v247_v17, %v246_v16 }
  0xb0   : > { %v249_v19 = vrot.slane %v248_v18, 2 }
  0xb2   : > { %v250_v21 = vadd.f32 %v249_v19, %v248_v18 }
  0xb4   : > { %v251_v22 = vrot.slane %v250_v21, 1 }
  0xb6   : > { %v252_v25 = vadd.f32 %v251_v22, %v250_v21 }
  0xb8   : > { %v254_v26 = vadd.f32 %v253_v24, %v252_v25 }
  0xba   : > { %v255_v28 = vmax.f32 %v254_v26, 0.0 }
  0xbc   : > { %v261_v30 = vrot.slane %v255_v28, %v260_v27 }
  0xbe   : > { %v262_v32 = vmul.f32 %v261_v30, %v256_v29  ;;  %v263_v34 = vmul.f32 %v261_v30, %v257_v31 }
  0xc0   : > { %v264_v33 = vsel %vm243_vm0, %v262_v32, 0.0  ;;  %v267_v35 = vsel %vm243_vm0, %v263_v34, 0.0 }
  0xc1   : > { %265 = vadd.xlane.f32.xlu1 %v264_v33 }
  0xc5   : > { %268 = vadd.xlane.f32.xlu1 %v267_v35 }
 0x14e   : > { %v266_v38 = vpop.xlane.xlu1 %265 }
 0x14f   : > { %v272_v39 = vadd.f32 %v270_v37, %v266_v38 }
 0x151   : > { %v274_v41 = vsub.f32 0.0, %v272_v39 }
 0x152   : > { %v269_v42 = vpop.xlane.xlu1 %268 }
 0x153   : > { %v276_v43 = vmul.f32 1.442695, %v274_v41  ;;  %v273_v44 = vadd.f32 %v271_v40, %v269_v42 }
 0x155   : > { %383 = vpow2.f32 %v276_v43  ;;  %v275_v45 = vsub.f32 0.0, %v273_v44 }
 0x157   : > { %v278_v46 = vmul.f32 1.442695, %v275_v45 }
 0x159   : > { %385 = vpow2.f32 %v278_v46 }
 0x15f   : > { %v384_v47 = vpop.eup %383 }
 0x160   : > { %v280_v48 = vadd.f32 1.0, %v384_v47 }
 0x162   : > { %387 = vrcp.f32 %v280_v48 }
 0x163   : > { %v386_v49 = vpop.eup %385 }
 0x164   : > { %v281_v50 = vadd.f32 1.0, %v386_v49 }
 0x166   : > { %389 = vrcp.f32 %v281_v50 }
 0x16c   : > { %v388_v51 = vpop.eup %387 }
 0x16d   : > { %288 = vperm.xlu0 %381, %v388_v51  }
 0x170   : > { %v390_v52 = vpop.eup %389 }
 0x171   : > { %293 = vperm.xlu1 %382, %v390_v52  }
 0x1ec   : > { %v289_v53 = vpop.permute.xlu0 %288 }
 0x1ed   : > { %v296_v54 = vmul.f32 %v289_v53, %v446_v0  ;;  %v297_v55 = vmul.f32 %v289_v53, %v448_v1 }
 0x1ef   : > { %300 = vst [vmem:[%s224_s15] sm:$0xff] %v296_v54  ;;  %301 = vst [vmem:[%s224_s15 + $0x8] sm:$0xff] %v297_v55 }
 0x1f0   : > { %v294_v56 = vpop.permute.xlu1 %293 }
 0x1f1   : > { %v298_v57 = vmul.f32 %v294_v56, %v450_v2  ;;  %v299_v58 = vmul.f32 %v294_v56, %v454_v4 }
 0x1f3   : > { %302 = vst [vmem:[%s224_s15 + $0x10] sm:$0xff] %v298_v57  ;;  %303 = vst [vmem:[%s224_s15 + $0x18] sm:$0xff] %v299_v58 }
 0x1f4 PF: > { %s15_s18 = sadd.s32 1, %s397_s18  }
 0x1f5   : > { %p12_p4 = scmp.ge.s32.totalorder %s15_s18, 4  }
 0x1f7   :  { %14 = sbr.rel (!%p12_p4) target bundleno = 1 (0x1), region = 70 }

</bundles_post_ra>
